<compile_context>
chip_gen: v5e
topology: v5e:2x2
jax: 0.10.0
libtpu: 0.0.40
codegen_flags: <defaults>
</compile_context>

<pallas_src>
import functools

import jax
import jax.numpy as jnp
from jax.experimental import pallas as pl
from jax.experimental.pallas import tpu as pltpu

BN_EPS = 1e-5
_VMEM_LIMIT = 32 * 1024 * 1024   # explicit scoped-VMEM ceiling, safe on v5e/v6e/v7x


# --------------------------------------------------------------------------- #
# Pass 1: 1x1 conv (MXU) + streaming per-sample channel statistics
# --------------------------------------------------------------------------- #
def _conv_stats_kernel(x_ref, wT_ref, b_ref, y_ref, sum_ref, sq_ref):
    # x_ref  : (1, Cin, Pt)   input tile, channels-first (f32 or bf16)
    # wT_ref : (Cout, Cin)    conv weight, VMEM-resident (constant index_map)
    # b_ref  : (Cout, 1)      conv bias (f32)
    # y_ref  : (1, Cout, Pt)  raw conv output tile (f32, streamed to HBM)
    # sum_ref, sq_ref : (1, Cout, 1) per-sample accumulators; same block index for
    #                   every p-tile -> stay resident, init on the first p-tile.
    y = jnp.dot(wT_ref[...], x_ref[0],
                preferred_element_type=jnp.float32)          # (Cout, Pt) on the MXU
    y = y + b_ref[...]                                       # (Cout,1) lane-broadcast
    y_ref[0] = y.astype(y_ref.dtype)

    s = jnp.sum(y, axis=1, keepdims=True)                    # (Cout, 1)  XLU reduce
    sq = jnp.sum(y * y, axis=1, keepdims=True)

    @pl.when(pl.program_id(1) == 0)
    def _():
        zeros = jnp.zeros(sum_ref.shape[1:], sum_ref.dtype)
        sum_ref[0] = zeros
        sq_ref[0] = zeros

    sum_ref[0] += s
    sq_ref[0] += sq


# --------------------------------------------------------------------------- #
# Pass 2: fused (BN x attention) scale/shift + ReLU + residual add
# --------------------------------------------------------------------------- #
def _scale_relu_residual_kernel(y_ref, res_ref, mul_ref, add_ref, o_ref):
    # y_ref   : (1, Cout, Pt) raw conv tile
    # res_ref : (1, Cout, Pt) residual tile (first Cout channels of f32 input)
    # mul_ref, add_ref : (1, Cout, 1) per-(sample, channel) multiplier / bias
    o_ref[0] = jnp.maximum(y_ref[0] * mul_ref[0] + add_ref[0], 0.0) + res_ref[0]


def _choose_p_tile(p, max_tile):
    """Largest multiple of 128 dividing p (capped at max_tile); else the whole row."""
    best = None
    t = 128
    while t <= min(max_tile, p):
        if p % t == 0:
            best = t
        t += 128
    return best if best is not None else p


@functools.partial(jax.jit, static_argnames=("compute_dtype", "p_tile"))
def fel_forward(x_nchw, params, *, compute_dtype=jnp.float32, p_tile=512):
    """x_nchw: (N, Cin, H, W) float32, like the PyTorch module. Returns (N, Cout, H, W)."""
    n, cin, hh, ww = x_nchw.shape
    p = hh * ww
    cout = params['wT'].shape[0]

    x_ncp = x_nchw.reshape(n, cin, p)          # free reshape: channels-first, spatial last
    pt = _choose_p_tile(p, p_tile)
    grid = (n, p // pt)

    x_in = x_ncp.astype(compute_dtype)         # bf16 here halves HBM read on v6e/v7x
    wT = params['wT'].astype(compute_dtype)
    b_col = params['b'].reshape(cout, 1)

    itemsize = jnp.dtype(compute_dtype).itemsize
    cost1 = pl.CostEstimate(
        flops=2 * n * p * cin * cout + 4 * n * p * cout,
        transcendentals=0,
        bytes_accessed=(n * cin * p * itemsize + cout * cin * itemsize
                        + n * cout * p * 4 + 2 * n * cout * 4 + cout * 4),
    )
    y_raw, sum_s, sq_s = pl.pallas_call(
        _conv_stats_kernel,
        grid=grid,
        in_specs=[
            pl.BlockSpec((1, cin, pt), lambda i, j: (i, 0, j)),    # x tile
            pl.BlockSpec((cout, cin), lambda i, j: (0, 0)),        # conv weight (resident)
            pl.BlockSpec((cout, 1), lambda i, j: (0, 0)),          # conv bias   (resident)
        ],
        out_specs=[
            pl.BlockSpec((1, cout, pt), lambda i, j: (i, 0, j)),   # y_raw (lane-dense)
            pl.BlockSpec((1, cout, 1), lambda i, j: (i, 0, 0)),    # per-sample sum
            pl.BlockSpec((1, cout, 1), lambda i, j: (i, 0, 0)),    # per-sample sum of squares
        ],
        out_shape=(
            jax.ShapeDtypeStruct((n, cout, p), jnp.float32),
            jax.ShapeDtypeStruct((n, cout, 1), jnp.float32),
            jax.ShapeDtypeStruct((n, cout, 1), jnp.float32),
        ),
        compiler_params=pltpu.CompilerParams(
            dimension_semantics=("parallel", "arbitrary"),
            vmem_limit_bytes=_VMEM_LIMIT),
        cost_estimate=cost1,
    )(x_in, wT, b_col)

    # ---- tiny O(N*Cout) glue (plain JAX, f32): fold BN + SE attention once ----
    cnt = n * p
    sum_c = jnp.sum(sum_s[..., 0], axis=0)                      # (Cout,)
    sq_c = jnp.sum(sq_s[..., 0], axis=0)
    mean = sum_c / cnt
    var = jnp.maximum(sq_c / cnt - mean * mean, 0.0)            # biased, training-mode BN
    scale = params['gamma'] * jax.lax.rsqrt(var + BN_EPS)       # (Cout,)
    shift = params['beta'] - mean * scale
    # global-average-pool of the *normalized* y, derived from the raw per-sample sums
    pooled = (sum_s[..., 0] / p) * scale[None, :] + shift[None, :]     # (N, Cout)
    h = jax.nn.relu(pooled @ params['w1'] + params['b1'])
    attn = jax.nn.sigmoid(h @ params['w2'] + params['b2'])             # (N, Cout)
    mul_nc = (attn * scale[None, :])[..., None]                 # (N, Cout, 1)
    add_nc = (attn * shift[None, :])[..., None]                 # (N, Cout, 1)

    cost2 = pl.CostEstimate(
        flops=4 * n * cout * p,
        transcendentals=0,
        bytes_accessed=3 * n * cout * p * 4 + 2 * n * cout * 4,
    )
    out_ncp = pl.pallas_call(
        _scale_relu_residual_kernel,
        grid=grid,
        in_specs=[
            pl.BlockSpec((1, cout, pt), lambda i, j: (i, 0, j)),   # y_raw tile
            pl.BlockSpec((1, cout, pt), lambda i, j: (i, 0, j)),   # residual = x[:, :Cout, :]
            pl.BlockSpec((1, cout, 1), lambda i, j: (i, 0, 0)),    # fused multiplier
            pl.BlockSpec((1, cout, 1), lambda i, j: (i, 0, 0)),    # fused bias
        ],
        out_specs=pl.BlockSpec((1, cout, pt), lambda i, j: (i, 0, j)),
        out_shape=jax.ShapeDtypeStruct((n, cout, p), jnp.float32),
        compiler_params=pltpu.CompilerParams(
            dimension_semantics=("parallel", "parallel"),
            vmem_limit_bytes=_VMEM_LIMIT),
        cost_estimate=cost2,
    )(y_raw, x_ncp, mul_nc, add_nc)

    return out_ncp.reshape(n, cout, hh, ww)                     # free reshape back to NCHW


def init_params(key, cin, cout):
    ch = max(cout // 16, 1)
    ks = jax.random.split(key, 5)
    s = lambda fan_in: 1.0 / jnp.sqrt(jnp.float32(fan_in))
    return dict(
        # conv weight stored (Cout, Cin) == PyTorch conv.weight[:, :, 0, 0]
        wT=jax.random.normal(ks[0], (cout, cin), jnp.float32) * s(cin),
        b=jax.random.normal(ks[1], (cout,), jnp.float32) * 0.1,
        # BatchNorm affine params (PyTorch defaults: weight=1, bias=0)
        gamma=jnp.ones((cout,), jnp.float32),
        beta=jnp.zeros((cout,), jnp.float32),
        # SE attention 1x1 convs (stored in matmul-friendly orientation)
        w1=jax.random.normal(ks[2], (cout, ch), jnp.float32) * s(cout),
        b1=jax.random.normal(ks[3], (ch,), jnp.float32) * 0.1,
        w2=jax.random.normal(ks[4], (ch, cout), jnp.float32) * s(ch),
        b2=jnp.zeros((cout,), jnp.float32),
    )


def fel_reference(x_nchw, params):
    """Pure-JAX mirror of the PyTorch FEL.forward (BatchNorm2d in training mode)."""
    n, cin, hh, ww = x_nchw.shape
    cout = params['wT'].shape[0]
    x = x_nchw.reshape(n, cin, hh * ww)
    y = jnp.einsum('oc,ncp->nop', params['wT'], x) + params['b'][None, :, None]
    mean = jnp.mean(y, axis=(0, 2), keepdims=True)
    var = jnp.mean((y - mean) ** 2, axis=(0, 2), keepdims=True)
    ybn = (y - mean) / jnp.sqrt(var + BN_EPS)
    ybn = ybn * params['gamma'][None, :, None] + params['beta'][None, :, None]
    pooled = jnp.mean(ybn, axis=2)                                    # (N, Cout)
    h = jax.nn.relu(pooled @ params['w1'] + params['b1'])
    attn = jax.nn.sigmoid(h @ params['w2'] + params['b2'])            # (N, Cout)
    out = jax.nn.relu(ybn * attn[:, :, None]) + x[:, :cout, :]
    return out.reshape(n, cout, hh, ww)


if __name__ == "__main__":
    # SEAL_CNN uses FEL(in_channels=512, out_channels=128) on a 7x7 feature map;
    # small shapes of the same structure here (Cout >= 16 for the //16 bottleneck).
    N, CIN, COUT, H, W = 2, 64, 32, 16, 16

    key = jax.random.PRNGKey(0)
    kx, kp, kx2 = jax.random.split(key, 3)
    x = jax.random.normal(kx, (N, CIN, H, W), jnp.float32)
    params = init_params(kp, CIN, COUT)

    # p_tile=128 so the small test exercises multi-tile statistics accumulation.
    out = jax.block_until_ready(fel_forward(x, params, p_tile=128))
    ref = fel_reference(x, params)
    assert out.shape == (N, COUT, H, W)
    assert float(jnp.max(jnp.abs(out - ref))) < 5e-4, "mismatch vs pure-JAX reference"

    # odd spatial size (like ResNet-18's 7x7 layer4 output): single full-row-tile path.
    x2 = jax.random.normal(kx2, (N, CIN, 7, 7), jnp.float32)
    out2 = jax.block_until_ready(fel_forward(x2, params))
    assert float(jnp.max(jnp.abs(out2 - fel_reference(x2, params)))) < 5e-4

    # bf16 MXU operands (halves dominant HBM read on v6e/v7x); f32 accumulation/stats.
    out_bf16 = jax.block_until_ready(
        fel_forward(x, params, compute_dtype=jnp.bfloat16, p_tile=128))
    assert float(jnp.max(jnp.abs(out_bf16 - ref))) < 2e-1

    print("KERNEL_OK")
</pallas_src>

<mosaic_0001>
module attributes {stable_mosaic.version = 11 : i64} {
  func.func @_conv_stats_kernel(%arg0: i32, %arg1: i32, %arg2: memref<1x64x128xf32, #tpu.memory_space<vmem>>, %arg3: memref<32x64xf32, #tpu.memory_space<vmem>>, %arg4: memref<32x1xf32, #tpu.memory_space<vmem>>, %arg5: memref<1x32x128xf32, #tpu.memory_space<vmem>>, %arg6: memref<1x32x1xf32, #tpu.memory_space<vmem>>, %arg7: memref<1x32x1xf32, #tpu.memory_space<vmem>>) attributes {dimension_semantics = [#tpu.dimension_semantics<parallel>, #tpu.dimension_semantics<arbitrary>], iteration_bounds = array<i64: 2, 2>, scalar_prefetch = 0 : i64, scratch_operands = 0 : i64, tpu.core_type = #tpu.core_type<tc>, window_params = [{transform_indices = @transform_0, window_bounds = array<i64: 1, 64, 128>}, {pipeline_mode = #tpu.pipeline_mode<synchronous>, transform_indices = @transform_1, window_bounds = array<i64: 32, 64>}, {pipeline_mode = #tpu.pipeline_mode<synchronous>, transform_indices = @transform_2, window_bounds = array<i64: 32, 1>}, {transform_indices = @transform_3, window_bounds = array<i64: 1, 32, 128>}, {transform_indices = @transform_4, window_bounds = array<i64: 1, 32, 1>}, {transform_indices = @transform_5, window_bounds = array<i64: 1, 32, 1>}]} {
    %c0 = arith.constant 0 : index
    %c0_0 = arith.constant 0 : index
    %0 = vector.load %arg3[%c0, %c0_0] : memref<32x64xf32, #tpu.memory_space<vmem>>, vector<32x64xf32>
    %c0_1 = arith.constant 0 : index
    %c0_2 = arith.constant 0 : index
    %c0_3 = arith.constant 0 : index
    %1 = vector.load %arg2[%c0_1, %c0_2, %c0_3] : memref<1x64x128xf32, #tpu.memory_space<vmem>>, vector<1x64x128xf32>
    %2 = vector.shape_cast %1 : vector<1x64x128xf32> to vector<64x128xf32>
    %cst = arith.constant dense<0.000000e+00> : vector<32x128xf32>
    %3 = tpu.matmul %0, %2, %cst {dimension_numbers = #tpu.dot_dimension_numbers<[1], [0], [0], [1], [0, 0, 1, 1], [], []>} : vector<32x64xf32>, vector<64x128xf32>, vector<32x128xf32> -> vector<32x128xf32>
    %c0_4 = arith.constant 0 : index
    %c0_5 = arith.constant 0 : index
    %4 = vector.load %arg4[%c0_4, %c0_5] : memref<32x1xf32, #tpu.memory_space<vmem>>, vector<32x1xf32>
    %5 = vector.broadcast %4 : vector<32x1xf32> to vector<32x128xf32>
    %6 = arith.addf %3, %5 : vector<32x128xf32>
    %c0_6 = arith.constant 0 : index
    %c0_7 = arith.constant 0 : index
    %c0_8 = arith.constant 0 : index
    %7 = vector.load %arg5[%c0_6, %c0_7, %c0_8] : memref<1x32x128xf32, #tpu.memory_space<vmem>>, vector<1x32x128xf32>
    %8 = vector.shape_cast %7 : vector<1x32x128xf32> to vector<32x128xf32>
    %9 = vector.shape_cast %6 : vector<32x128xf32> to vector<1x32x128xf32>
    tpu.vector_store %arg5[%c0_6, %c0_7, %c0_8], %9 {strides = array<i32>} : memref<1x32x128xf32, #tpu.memory_space<vmem>>, vector<1x32x128xf32>,
    %cst_9 = arith.constant dense<0.000000e+00> : vector<32xf32>
    %10 = vector.multi_reduction <add>, %6, %cst_9 [1] : vector<32x128xf32> to vector<32xf32>
    %11 = vector.shape_cast %10 : vector<32xf32> to vector<32x1xf32>
    %12 = arith.mulf %6, %6 : vector<32x128xf32>
    %cst_10 = arith.constant dense<0.000000e+00> : vector<32xf32>
    %13 = vector.multi_reduction <add>, %12, %cst_10 [1] : vector<32x128xf32> to vector<32xf32>
    %14 = vector.shape_cast %13 : vector<32xf32> to vector<32x1xf32>
    %c0_i32 = arith.constant 0 : i32
    %15 = arith.cmpi eq, %arg1, %c0_i32 : i32
    %16 = arith.extui %15 : i1 to i32
    %c0_i32_11 = arith.constant 0 : i32
    %17 = arith.cmpi ne, %16, %c0_i32_11 : i32
    scf.if %17 {
      %cst_24 = arith.constant 0.000000e+00 : f32
      %30 = vector.broadcast %cst_24 : f32 to vector<32x1xf32>
      %c0_25 = arith.constant 0 : index
      %c0_26 = arith.constant 0 : index
      %c0_27 = arith.constant 0 : index
      %31 = vector.load %arg6[%c0_25, %c0_26, %c0_27] : memref<1x32x1xf32, #tpu.memory_space<vmem>>, vector<1x32x1xf32>
      %32 = vector.shape_cast %31 : vector<1x32x1xf32> to vector<32x1xf32>
      %33 = vector.shape_cast %30 : vector<32x1xf32> to vector<1x32x1xf32>
      tpu.vector_store %arg6[%c0_25, %c0_26, %c0_27], %33 {strides = array<i32>} : memref<1x32x1xf32, #tpu.memory_space<vmem>>, vector<1x32x1xf32>,
      %c0_28 = arith.constant 0 : index
      %c0_29 = arith.constant 0 : index
      %c0_30 = arith.constant 0 : index
      %34 = vector.load %arg7[%c0_28, %c0_29, %c0_30] : memref<1x32x1xf32, #tpu.memory_space<vmem>>, vector<1x32x1xf32>
      %35 = vector.shape_cast %34 : vector<1x32x1xf32> to vector<32x1xf32>
      %36 = vector.shape_cast %30 : vector<32x1xf32> to vector<1x32x1xf32>
      tpu.vector_store %arg7[%c0_28, %c0_29, %c0_30], %36 {strides = array<i32>} : memref<1x32x1xf32, #tpu.memory_space<vmem>>, vector<1x32x1xf32>,
    } else {
    }
    %c0_12 = arith.constant 0 : index
    %c0_13 = arith.constant 0 : index
    %c0_14 = arith.constant 0 : index
    %18 = vector.load %arg6[%c0_12, %c0_13, %c0_14] : memref<1x32x1xf32, #tpu.memory_space<vmem>>, vector<1x32x1xf32>
    %19 = vector.shape_cast %18 : vector<1x32x1xf32> to vector<32x1xf32>
    %20 = arith.addf %19, %11 : vector<32x1xf32>
    %c0_15 = arith.constant 0 : index
    %c0_16 = arith.constant 0 : index
    %c0_17 = arith.constant 0 : index
    %21 = vector.load %arg6[%c0_15, %c0_16, %c0_17] : memref<1x32x1xf32, #tpu.memory_space<vmem>>, vector<1x32x1xf32>
    %22 = vector.shape_cast %21 : vector<1x32x1xf32> to vector<32x1xf32>
    %23 = vector.shape_cast %20 : vector<32x1xf32> to vector<1x32x1xf32>
    tpu.vector_store %arg6[%c0_15, %c0_16, %c0_17], %23 {strides = array<i32>} : memref<1x32x1xf32, #tpu.memory_space<vmem>>, vector<1x32x1xf32>,
    %c0_18 = arith.constant 0 : index
    %c0_19 = arith.constant 0 : index
    %c0_20 = arith.constant 0 : index
    %24 = vector.load %arg7[%c0_18, %c0_19, %c0_20] : memref<1x32x1xf32, #tpu.memory_space<vmem>>, vector<1x32x1xf32>
    %25 = vector.shape_cast %24 : vector<1x32x1xf32> to vector<32x1xf32>
    %26 = arith.addf %25, %14 : vector<32x1xf32>
    %c0_21 = arith.constant 0 : index
    %c0_22 = arith.constant 0 : index
    %c0_23 = arith.constant 0 : index
    %27 = vector.load %arg7[%c0_21, %c0_22, %c0_23] : memref<1x32x1xf32, #tpu.memory_space<vmem>>, vector<1x32x1xf32>
    %28 = vector.shape_cast %27 : vector<1x32x1xf32> to vector<32x1xf32>
    %29 = vector.shape_cast %26 : vector<32x1xf32> to vector<1x32x1xf32>
    tpu.vector_store %arg7[%c0_21, %c0_22, %c0_23], %29 {strides = array<i32>} : memref<1x32x1xf32, #tpu.memory_space<vmem>>, vector<1x32x1xf32>,
    return
  }
  func.func @transform_0(%arg0: i32, %arg1: i32) -> (i32, i32, i32) {
    %c0_i32 = arith.constant 0 : i32
    %c0_i32_0 = arith.constant 0 : i32
    return %arg0, %c0_i32, %arg1 : i32, i32, i32
  }
  func.func @transform_1(%arg0: i32, %arg1: i32) -> (i32, i32) {
    %c0_i32 = arith.constant 0 : i32
    %c0_i32_0 = arith.constant 0 : i32
    %c0_i32_1 = arith.constant 0 : i32
    return %c0_i32, %c0_i32_0 : i32, i32
  }
  func.func @transform_2(%arg0: i32, %arg1: i32) -> (i32, i32) {
    %c0_i32 = arith.constant 0 : i32
    %c0_i32_0 = arith.constant 0 : i32
    %c0_i32_1 = arith.constant 0 : i32
    return %c0_i32, %c0_i32_0 : i32, i32
  }
  func.func @transform_3(%arg0: i32, %arg1: i32) -> (i32, i32, i32) {
    %c0_i32 = arith.constant 0 : i32
    %c0_i32_0 = arith.constant 0 : i32
    return %arg0, %c0_i32, %arg1 : i32, i32, i32
  }
  func.func @transform_4(%arg0: i32, %arg1: i32) -> (i32, i32, i32) {
    %c0_i32 = arith.constant 0 : i32
    %c0_i32_0 = arith.constant 0 : i32
    %c0_i32_1 = arith.constant 0 : i32
    return %arg0, %c0_i32, %c0_i32_0 : i32, i32, i32
  }
  func.func @transform_5(%arg0: i32, %arg1: i32) -> (i32, i32, i32) {
    %c0_i32 = arith.constant 0 : i32
    %c0_i32_0 = arith.constant 0 : i32
    %c0_i32_1 = arith.constant 0 : i32
    return %arg0, %c0_i32, %c0_i32_0 : i32, i32, i32
  }
}

module attributes {stable_mosaic.version = 11 : i64} {
  func.func @_scale_relu_residual_kernel(%arg0: i32, %arg1: i32, %arg2: memref<1x32x128xf32, #tpu.memory_space<vmem>>, %arg3: memref<1x32x128xf32, #tpu.memory_space<vmem>>, %arg4: memref<1x32x1xf32, #tpu.memory_space<vmem>>, %arg5: memref<1x32x1xf32, #tpu.memory_space<vmem>>, %arg6: memref<1x32x128xf32, #tpu.memory_space<vmem>>) attributes {dimension_semantics = [#tpu.dimension_semantics<parallel>, #tpu.dimension_semantics<parallel>], iteration_bounds = array<i64: 2, 2>, scalar_prefetch = 0 : i64, scratch_operands = 0 : i64, tpu.core_type = #tpu.core_type<tc>, window_params = [{transform_indices = @transform_0, window_bounds = array<i64: 1, 32, 128>}, {transform_indices = @transform_1, window_bounds = array<i64: 1, 32, 128>}, {transform_indices = @transform_2, window_bounds = array<i64: 1, 32, 1>}, {transform_indices = @transform_3, window_bounds = array<i64: 1, 32, 1>}, {transform_indices = @transform_4, window_bounds = array<i64: 1, 32, 128>}]} {
    %c0 = arith.constant 0 : index
    %c0_0 = arith.constant 0 : index
    %c0_1 = arith.constant 0 : index
    %0 = vector.load %arg2[%c0, %c0_0, %c0_1] : memref<1x32x128xf32, #tpu.memory_space<vmem>>, vector<1x32x128xf32>
    %1 = vector.shape_cast %0 : vector<1x32x128xf32> to vector<32x128xf32>
    %c0_2 = arith.constant 0 : index
    %c0_3 = arith.constant 0 : index
    %c0_4 = arith.constant 0 : index
    %2 = vector.load %arg4[%c0_2, %c0_3, %c0_4] : memref<1x32x1xf32, #tpu.memory_space<vmem>>, vector<1x32x1xf32>
    %3 = vector.shape_cast %2 : vector<1x32x1xf32> to vector<32x1xf32>
    %4 = vector.broadcast %3 : vector<32x1xf32> to vector<32x128xf32>
    %5 = arith.mulf %1, %4 : vector<32x128xf32>
    %c0_5 = arith.constant 0 : index
    %c0_6 = arith.constant 0 : index
    %c0_7 = arith.constant 0 : index
    %6 = vector.load %arg5[%c0_5, %c0_6, %c0_7] : memref<1x32x1xf32, #tpu.memory_space<vmem>>, vector<1x32x1xf32>
    %7 = vector.shape_cast %6 : vector<1x32x1xf32> to vector<32x1xf32>
    %8 = vector.broadcast %7 : vector<32x1xf32> to vector<32x128xf32>
    %9 = arith.addf %5, %8 : vector<32x128xf32>
    %cst = arith.constant 0.000000e+00 : f32
    %10 = vector.broadcast %cst : f32 to vector<32x128xf32>
    %11 = arith.maximumf %9, %10 : vector<32x128xf32>
    %c0_8 = arith.constant 0 : index
    %c0_9 = arith.constant 0 : index
    %c0_10 = arith.constant 0 : index
    %12 = vector.load %arg3[%c0_8, %c0_9, %c0_10] : memref<1x32x128xf32, #tpu.memory_space<vmem>>, vector<1x32x128xf32>
    %13 = vector.shape_cast %12 : vector<1x32x128xf32> to vector<32x128xf32>
    %14 = arith.addf %11, %13 : vector<32x128xf32>
    %c0_11 = arith.constant 0 : index
    %c0_12 = arith.constant 0 : index
    %c0_13 = arith.constant 0 : index
    %15 = vector.load %arg6[%c0_11, %c0_12, %c0_13] : memref<1x32x128xf32, #tpu.memory_space<vmem>>, vector<1x32x128xf32>
    %16 = vector.shape_cast %15 : vector<1x32x128xf32> to vector<32x128xf32>
    %17 = vector.shape_cast %14 : vector<32x128xf32> to vector<1x32x128xf32>
    tpu.vector_store %arg6[%c0_11, %c0_12, %c0_13], %17 {strides = array<i32>} : memref<1x32x128xf32, #tpu.memory_space<vmem>>, vector<1x32x128xf32>,
    return
  }
  func.func @transform_0(%arg0: i32, %arg1: i32) -> (i32, i32, i32) {
    %c0_i32 = arith.constant 0 : i32
    %c0_i32_0 = arith.constant 0 : i32
    return %arg0, %c0_i32, %arg1 : i32, i32, i32
  }
  func.func @transform_1(%arg0: i32, %arg1: i32) -> (i32, i32, i32) {
    %c0_i32 = arith.constant 0 : i32
    %c0_i32_0 = arith.constant 0 : i32
    return %arg0, %c0_i32, %arg1 : i32, i32, i32
  }
  func.func @transform_2(%arg0: i32, %arg1: i32) -> (i32, i32, i32) {
    %c0_i32 = arith.constant 0 : i32
    %c0_i32_0 = arith.constant 0 : i32
    %c0_i32_1 = arith.constant 0 : i32
    return %arg0, %c0_i32, %c0_i32_0 : i32, i32, i32
  }
  func.func @transform_3(%arg0: i32, %arg1: i32) -> (i32, i32, i32) {
    %c0_i32 = arith.constant 0 : i32
    %c0_i32_0 = arith.constant 0 : i32
    %c0_i32_1 = arith.constant 0 : i32
    return %arg0, %c0_i32, %c0_i32_0 : i32, i32, i32
  }
  func.func @transform_4(%arg0: i32, %arg1: i32) -> (i32, i32, i32) {
    %c0_i32 = arith.constant 0 : i32
    %c0_i32_0 = arith.constant 0 : i32
    return %arg0, %c0_i32, %arg1 : i32, i32, i32
  }
}

</mosaic_0001>

<bundles_post_ra>
// kernel: fel_forward.3
= control target key start
LH: loop header
LB: loop body
LE: loop exit
PB: predicated region body
PF: predicated region fallthrough
CT: control target
= control target key end

     0   :  { %s783_s15 = smov 0   ;;  %s785_s16 = smov 0   ;;  %s911_s0 = inlined_call_operand.vmem [shape: f32[2,32,256], index: 0, kind: input, shape index: {}]   ;;  %s912_s1 = inlined_call_operand.vmem [shape: f32[2,64,256], index: 1, kind: input, shape index: {}]   ;;  %s913_s2 = inlined_call_operand.vmem [shape: f32[2,32,1], index: 2, kind: input, shape index: {}]   ;;  %s914_s3 = inlined_call_operand.vmem [shape: f32[2,32,1], index: 3, kind: input, shape index: {}]   ;;  %s915_s4 = inlined_call_operand.vmem [shape: f32[2,32,256], index: 4, kind: output, shape index: {}]  }
   0x1   :  { %s787_s17 = smov 0   ;;  %s789_s18 = smov 0  }
   0x2   :  { %s791_s19 = smov 0   ;;  %s793_s20 = smov 0  }
   0x3   :  { %s795_s21 = smov 0  }
   0x4 LB: > { %s23_s22 = sadd.s32 1, %s747_s19  ;;  %s26_s23 = sadd.s32 1, %s751_s20  ;;  %s755_s21 = sphi %s795_s21, %s14_s21   ;;  %s751_s20 = sphi %s793_s20, %s923_s20   ;;  %s747_s19 = sphi %s791_s19, %s922_s19   ;;  %s743_s18 = sphi %s789_s18, %s921_s18   ;;  %s739_s17 = sphi %s787_s17, %s920_s17   ;;  %s735_s16 = sphi %s785_s16, %s919_s16   ;;  %s731_s15 = sphi %s783_s15, %s918_s15  }
   0x5   : > { %p24_p0 = scmp.ge.s32.totalorder %s23_s22, 2  ;;  %s616_s24 = sadd.s32 4294967295, %s755_s21  }
   0x6   : > { %p42_p1 = scmp.ne.s32.totalorder %s735_s16, %s731_s15  ;;  %p43_p2 = scmp.eq.s32.totalorder %s755_s21, 0 }
   0x7   : > { %s925_s22 = smov (%p24_p0, %s23_s22), 0  ;;  %s927_s23 = smov (!%p24_p0, %s26_s23), %s751_s20 }
   0x8   : > { %p28_p3 = scmp.ge.s32.totalorder %s927_s23, 2  ;;  %p154_p4 = scmp.eq.s32.totalorder %s616_s24, 3 }
   0x9   : > { %s31_s25 = ssub.s32 %s747_s19, %s925_s22  ;;  %p829_p5 = por %p43_p2, %p42_p1 }
   0xa   : > { %s929_s23 = smov (%p28_p3, %s927_s23), 0  ;;  %p835_p6 = por %p154_p4, %p42_p1 }
   0xb   : > { %s30_s28 = ssub.s32 %s751_s20, %s929_s23  ;;  %s35_s30 = sadd.s32 1, %s735_s16 }
   0xc   : > { %s32_s29 = sor.u32 %s31_s25, %s30_s28  ;;  %p619_p8 = scmp.ge.s32.totalorder %s755_s21, 4 }
   0xd   : > { %p33_p7 = scmp.eq.s32.totalorder %s32_s29, 0 }
   0xe   : > { %176 = sbr.rel (%p619_p8) target bundleno = 39 (0x27), region = 16 }
   0xf   : > { %s843_s5 = scalar_select %p33_p7, %s735_s16, %s35_s30  }
  0x13   : > { %179 = sbr.rel (!%p829_p5) target bundleno = 29 (0x1d), region = 20  ;;  %s181_s6 = sand.u32 (%p829_p5), 1, %s735_s16  }
  0x14   : > { %s621_s7 = sshll.u32 (%p829_p5), %s751_s20, 3  ;;  %s620_s8 = sshll.u32 (%p829_p5), %s181_s6, 5 }
  0x15   : > { %s185_s9 = sadd.s32 (%p829_p5), %s747_s19, %s621_s7  ;;  %s183_s14 = scalar_lea.vmem (%p829_p5), [#allocation2], %s620_s8 }
  0x16   : > { %s622_s10 = sshll.u32 (%p829_p5), %s185_s9, 3 }
  0x17   : > { %s187_s13 = scalar_lea.vmem (%p829_p5), %s911_s0, %s622_s10 }
  0x18   : > { %v222_v0 = vld [vmem:[%s187_s13] sm:$0xff]  ;;  %v224_v1 = vld [vmem:[%s187_s13 + $0x10] sm:$0xff] }
  0x19   : > { %v226_v2 = vld [vmem:[%s187_s13 + $0x20] sm:$0xff]  ;;  %223 = vst [vmem:[%s183_s14] sm:$0xff] %v222_v0  ;;  %v228_v3 = vld [vmem:[%s187_s13 + $0x30] sm:$0xff] }
  0x1a   : > { %225 = vst [vmem:[%s183_s14 + $0x8] sm:$0xff] %v224_v1 }
  0x1b   : > { %227 = vst [vmem:[%s183_s14 + $0x10] sm:$0xff] %v226_v2 }
  0x1c   : > { %229 = vst [vmem:[%s183_s14 + $0x18] sm:$0xff] %v228_v3 }
  0x1d PF: > { %235 = sbr.rel (!%p829_p5) target bundleno = 39 (0x27), region = 58  ;;  %s237_s24 = sand.u32 (%p829_p5), 1, %s735_s16  }
  0x1e   : > { %s624_s25 = sshll.u32 (%p829_p5), %s751_s20, 4  ;;  %s623_s28 = sshll.u32 (%p829_p5), %s237_s24, 5 }
  0x1f   : > { %s241_s29 = sadd.s32 (%p829_p5), %s747_s19, %s624_s25  ;;  %s239_s9 = scalar_lea.vmem (%p829_p5), [#allocation3], %s623_s28 }
  0x20   : > { %s625_s30 = sshll.u32 (%p829_p5), %s241_s29, 3 }
  0x21   : > { %s243_s8 = scalar_lea.vmem (%p829_p5), %s912_s1, %s625_s30 }
  0x22   : > { %v278_v4 = vld [vmem:[%s243_s8] sm:$0xff]  ;;  %v280_v5 = vld [vmem:[%s243_s8 + $0x10] sm:$0xff] }
  0x23   : > { %v282_v6 = vld [vmem:[%s243_s8 + $0x20] sm:$0xff]  ;;  %279 = vst [vmem:[%s239_s9] sm:$0xff] %v278_v4  ;;  %v284_v7 = vld [vmem:[%s243_s8 + $0x30] sm:$0xff] }
  0x24   : > { %281 = vst [vmem:[%s239_s9 + $0x8] sm:$0xff] %v280_v5 }
  0x25   : > { %283 = vst [vmem:[%s239_s9 + $0x10] sm:$0xff] %v282_v6 }
  0x26   : > { %285 = vst [vmem:[%s239_s9 + $0x18] sm:$0xff] %v284_v7 }
  0x27 PF: > { %p626_p9 = scmp.ge.s32.totalorder %s755_s21, 1  ;;  %p306_p10 = scmp.lt.s32.totalorder %s755_s21, 5 }
  0x29   : > { %p307_p11 = pnand %p626_p9, %p306_p10 }
  0x2a   : > { %p358_p12 = scmp.lt.s32.totalorder (!%p307_p11), %s743_s18, 1  ;;  %s313_s28 = sand.u32 (!%p307_p11), 1, %s731_s15  }
  0x2b   : > { %310 = sbr.rel (%p307_p11) target bundleno = 200 (0xc8), region = 104  ;;  %s627_s29 = sshll.u32 (!%p307_p11), %s313_s28, 5 }
  0x2c   : > { %s315_s30 = scalar_lea.vmem (!%p307_p11), [#allocation2], %s627_s29  ;;  %s322_s6 = scalar_lea.vmem (!%p307_p11), [#allocation3], %s627_s29 }
  0x2d   : > { %s873_s7 = scalar_lea.vmem (!%p307_p11), [#allocation4], %s627_s29 }
  0x30   : > { %v757_v8 = vmov 0   ;;  %s359_s26 = scalar_select %p358_p12, %s743_s18, 1  ;;  %v368_v17 = vld [vmem:[%s315_s30] sm:$0xff]  ;;  %v369_v25 = vld [vmem:[%s315_s30 + $0x8] sm:$0xff]  ;;  %v370_v32 = vld [vmem:[%s315_s30 + $0x10] sm:$0xff] }
  0x31   : > { %699 = vset.pattern.permute.xlu1 %v757_v8  ;;  %698 = vset.pattern.permute.xlu0 %v757_v8  ;;  %v432_v23 = vld [vmem:[%s322_s6] sm:$0xff]  ;;  %v371_v33 = vld [vmem:[%s315_s30 + $0x18] sm:$0xff]  ;;  %v433_v34 = vld [vmem:[%s322_s6 + $0x8] sm:$0xff]  ;;  %s635_s15 = sshll.u32 (%p835_p6), %s743_s18, 3 }
  0x32   : > { %700 = vset.pattern.permute.xlu2 %v757_v8  ;;  %s639_s10 = sshll.u32 %s359_s26, 5  ;;  %v435_v43 = vld [vmem:[%s322_s6 + $0x18] sm:$0xff]  ;;  %v434_v44 = vld [vmem:[%s322_s6 + $0x10] sm:$0xff]  ;;  %s452_s8 = sadd.s32 (%p835_p6), %s739_s17, %s635_s15 }
  0x33   : > { %s362_s13 = scalar_lea.vmem %s913_s2, %s639_s10  ;;  %s367_s25 = scalar_lea.vmem %s914_s3, %s639_s10 }
  0x34   : > { %v374_v9 = vld [vmem:[%s362_s13 + $0x10] sm:$0xff]  ;;  %v372_v10 = vld [vmem:[%s362_s13] sm:$0xff]  ;;  %v375_v12 = vld [vmem:[%s362_s13 + $0x18] sm:$0xff]  ;;  %s636_s9 = sshll.u32 (%p835_p6), %s452_s8, 3 }
  0x35   : > { %388 = vperm.xlu1 %699, %v374_v9   ;;  %378 = vperm.xlu0 %698, %v372_v10   ;;  %v400_v11 = vld [vmem:[%s367_s25] sm:$0xff]  ;;  %v373_v13 = vld [vmem:[%s362_s13 + $0x8] sm:$0xff]  ;;  %v403_v15 = vld [vmem:[%s367_s25 + $0x18] sm:$0xff]  ;;  %s454_s11 = scalar_lea.vmem (%p835_p6), %s915_s4, %s636_s9 }
  0x36   : > { %406 = vperm.xlu2 %700, %v400_v11   ;;  %v401_v14 = vld [vmem:[%s367_s25 + $0x8] sm:$0xff]  ;;  %v402_v16 = vld [vmem:[%s367_s25 + $0x10] sm:$0xff] }
  0x3d   : > { %393 = vperm.xlu1 %699, %v375_v12   ;;  %383 = vperm.xlu0 %698, %v373_v13  }
  0x3e   : > { %411 = vperm.xlu2 %700, %v401_v14  }
  0x45   : > { %421 = vperm.xlu1 %699, %v403_v15   ;;  %416 = vperm.xlu0 %698, %v402_v16  }
  0x90   : > { %v407_v18 = vpop.permute.xlu2 %406 }
  0x98   : > { %v412_v30 = vpop.permute.xlu2 %411 }
  0xa7   : > { %v389_v19 = vpop.permute.xlu1 %388  ;;  %v379_v20 = vpop.permute.xlu0 %378 }
  0xa8   : > { %v396_v21 = vmul.f32 %v379_v20, %v368_v17  ;;  %v398_v36 = vmul.f32 %v389_v19, %v370_v32 }
  0xaa   : > { %v424_v22 = vadd.f32 %v407_v18, %v396_v21 }
  0xac   : > { %v428_v24 = vmax.f32 %v424_v22, 0.0 }
  0xae   : > { %v436_v26 = vadd.f32 %v432_v23, %v428_v24 }
  0xaf   : > { %v394_v27 = vpop.permute.xlu1 %393  ;;  %v384_v28 = vpop.permute.xlu0 %383 }
  0xb0   : > { %440 = vst [vmem:[%s873_s7] sm:$0xff] %v436_v26  ;;  %v397_v29 = vmul.f32 %v384_v28, %v369_v25  ;;  %v399_v37 = vmul.f32 %v394_v27, %v371_v33 }
  0xb2   : > { %v425_v31 = vadd.f32 %v412_v30, %v397_v29 }
  0xb4   : > { %v429_v35 = vmax.f32 %v425_v31, 0.0 }
  0xb6   : > { %v437_v38 = vadd.f32 %v433_v34, %v429_v35 }
  0xb7   : > { %v422_v39 = vpop.permute.xlu1 %421  ;;  %v417_v40 = vpop.permute.xlu0 %416  ;;  %v489_v49 = vld [vmem:[%s873_s7] sm:$0xff] (%p835_p6) }
  0xb8   : > { %441 = vst [vmem:[%s873_s7 + $0x8] sm:$0xff] %v437_v38  ;;  %v427_v41 = vadd.f32 %v422_v39, %v399_v37  ;;  %v426_v42 = vadd.f32 %v417_v40, %v398_v36 }
  0xb9   : > { %490 = vst [vmem:[%s454_s11] sm:$0xff] (%p835_p6), %v489_v49 }
  0xba   : > { %v431_v45 = vmax.f32 %v427_v41, 0.0  ;;  %v430_v46 = vmax.f32 %v426_v42, 0.0 }
  0xbb   : > { %450 = sbr.rel (!%p835_p6) target bundleno = 200 (0xc8), region = 116 }
  0xbc   : > { %v439_v47 = vadd.f32 %v435_v43, %v431_v45  ;;  %v438_v48 = vadd.f32 %v434_v44, %v430_v46 }
  0xbe   : > { %443 = vst [vmem:[%s873_s7 + $0x18] sm:$0xff] %v439_v47 }
  0xbf   : > { %442 = vst [vmem:[%s873_s7 + $0x10] sm:$0xff] %v438_v48  ;;  %v491_v50 = vld [vmem:[%s873_s7 + $0x8] sm:$0xff] (%p835_p6) }
  0xc0   : > { %492 = vst [vmem:[%s454_s11 + $0x10] sm:$0xff] %v491_v50 }
  0xc5   : > { %v495_v52 = vld [vmem:[%s873_s7 + $0x18] sm:$0xff] }
  0xc6   : > { %v493_v51 = vld [vmem:[%s873_s7 + $0x10] sm:$0xff]  ;;  %496 = vst [vmem:[%s454_s11 + $0x30] sm:$0xff] %v495_v52 }
  0xc7   : > { %494 = vst [vmem:[%s454_s11 + $0x20] sm:$0xff] %v493_v51 }
  0xc8 PF: > { %s14_s21 = sadd.s32 1, %s755_s21   ;;  %s918_s15 = smov %s735_s16 }
  0xc9   : > { %p11_p13 = scmp.ge.s32.totalorder %s14_s21, 6   ;;  %s919_s16 = smov %s843_s5 }
  0xca   : > { %s920_s17 = smov %s747_s19  ;;  %s921_s18 = smov %s751_s20 }
  0xcb   : > { %s922_s19 = smov %s925_s22  ;;  %s923_s20 = smov %s929_s23 }
  0xcc   :  { %13 = sbr.rel (!%p11_p13) target bundleno = 4 (0x4), region = 199 }

// kernel: fel_forward.2
= control target key start
LH: loop header
LB: loop body
LE: loop exit
PB: predicated region body
PF: predicated region fallthrough
CT: control target
= control target key end

     0   :  { %s857_s18 = smov 0   ;;  %s859_s19 = smov 0   ;;  %s1050_s0 = inlined_call_operand.vmem [shape: f32[2,64,256], index: 0, kind: input, shape index: {}]   ;;  %s1051_s1 = inlined_call_operand.vmem [shape: f32[32,64], index: 1, kind: input, shape index: {}]   ;;  %s1052_s2 = inlined_call_operand.vmem [shape: f32[32,1], index: 2, kind: input, shape index: {}]   ;;  %s1053_s3 = inlined_call_operand.vmem [shape: f32[2,32,256], index: 3, kind: output, shape index: {0}]   ;;  %s1054_s4 = inlined_call_operand.vmem [shape: f32[2,32,1], index: 4, kind: output, shape index: {1}]   ;;  %s1055_s5 = inlined_call_operand.vmem [shape: f32[2,32,1], index: 5, kind: output, shape index: {2}]  }
   0x1   :  { %s861_s20 = smov 0   ;;  %s863_s21 = smov 0  }
   0x2   :  { %s865_s22 = smov 0   ;;  %s867_s23 = smov 0  }
   0x3   :  { %s869_s24 = smov 0  }
   0x4 LB: > { %s25_s25 = sadd.s32 1, %s815_s22  ;;  %s28_s26 = sadd.s32 1, %s819_s23  ;;  %s823_s24 = sphi %s869_s24, %s16_s24   ;;  %s819_s23 = sphi %s867_s23, %s1062_s23   ;;  %s815_s22 = sphi %s865_s22, %s1061_s22   ;;  %s811_s21 = sphi %s863_s21, %s1060_s21   ;;  %s807_s20 = sphi %s861_s20, %s1059_s20   ;;  %s803_s19 = sphi %s859_s19, %s1058_s19   ;;  %s799_s18 = sphi %s857_s18, %s1057_s18  }
   0x5   : > { %p26_p0 = scmp.ge.s32.totalorder %s25_s25, 2  ;;  %s659_s27 = sadd.s32 4294967295, %s823_s24  }
   0x6   : > { %p44_p1 = scmp.ne.s32.totalorder %s803_s19, %s799_s18  ;;  %p45_p2 = scmp.eq.s32.totalorder %s823_s24, 0 }
   0x7   : > { %s1064_s25 = smov (%p26_p0, %s25_s25), 0  ;;  %s1066_s26 = smov (!%p26_p0, %s28_s26), %s819_s23 }
   0x8   : > { %p30_p3 = scmp.ge.s32.totalorder %s1066_s26, 2  ;;  %p118_p4 = scmp.eq.s32.totalorder %s659_s27, 3 }
   0x9   : > { %s33_s28 = ssub.s32 %s815_s22, %s1064_s25  ;;  %p46_p5 = por %p45_p2, %p44_p1 }
   0xa   : > { %s1068_s26 = smov (%p30_p3, %s1066_s26), 0  ;;  %p905_p6 = por %p118_p4, %p44_p1 }
   0xb   : > { %s32_s30 = ssub.s32 %s819_s23, %s1068_s26  ;;  %s37_s7 = sadd.s32 1, %s803_s19 }
   0xc   : > { %s34_s6 = sor.u32 %s33_s28, %s32_s30  ;;  %p662_p8 = scmp.ge.s32.totalorder %s823_s24, 4 }
   0xd   : > { %p35_p7 = scmp.eq.s32.totalorder %s34_s6, 0 }
   0xe   : > { %198 = sbr.rel (%p662_p8) target bundleno = 33 (0x21), region = 24 }
   0xf   : > { %s913_s8 = scalar_select %p35_p7, %s803_s19, %s37_s7  }
  0x13   : > { %201 = sbr.rel (!%p46_p5) target bundleno = 33 (0x21), region = 28  ;;  %s203_s9 = sand.u32 (%p46_p5), 1, %s803_s19  }
  0x14   : > { %s664_s10 = sshll.u32 (%p46_p5), %s819_s23, 4  ;;  %s663_s11 = sshll.u32 (%p46_p5), %s203_s9, 6 }
  0x15   : > { %s207_s12 = sadd.s32 (%p46_p5), %s815_s22, %s664_s10  ;;  %s205_s17 = scalar_lea.vmem (%p46_p5), [#allocation2], %s663_s11 }
  0x16   : > { %s665_s13 = sshll.u32 (%p46_p5), %s207_s12, 3 }
  0x17   : > { %s209_s16 = scalar_lea.vmem (%p46_p5), %s1050_s0, %s665_s13 }
  0x18   : > { %v252_v0 = vld [vmem:[%s209_s16] sm:$0xff]  ;;  %v254_v1 = vld [vmem:[%s209_s16 + $0x10] sm:$0xff] }
  0x19   : > { %v256_v2 = vld [vmem:[%s209_s16 + $0x20] sm:$0xff]  ;;  %253 = vst [vmem:[%s205_s17] sm:$0xff] %v252_v0  ;;  %v258_v3 = vld [vmem:[%s209_s16 + $0x30] sm:$0xff] }
  0x1a   : > { %255 = vst [vmem:[%s205_s17 + $0x8] sm:$0xff] %v254_v1  ;;  %v260_v4 = vld [vmem:[%s209_s16 + $0x40] sm:$0xff]  ;;  %v262_v5 = vld [vmem:[%s209_s16 + $0x50] sm:$0xff] }
  0x1b   : > { %257 = vst [vmem:[%s205_s17 + $0x10] sm:$0xff] %v256_v2  ;;  %v264_v6 = vld [vmem:[%s209_s16 + $0x60] sm:$0xff]  ;;  %v266_v7 = vld [vmem:[%s209_s16 + $0x70] sm:$0xff] }
  0x1c   : > { %259 = vst [vmem:[%s205_s17 + $0x18] sm:$0xff] %v258_v3 }
  0x1d   : > { %261 = vst [vmem:[%s205_s17 + $0x20] sm:$0xff] %v260_v4 }
  0x1e   : > { %263 = vst [vmem:[%s205_s17 + $0x28] sm:$0xff] %v262_v5 }
  0x1f   : > { %265 = vst [vmem:[%s205_s17 + $0x30] sm:$0xff] %v264_v6 }
  0x20   : > { %267 = vst [vmem:[%s205_s17 + $0x38] sm:$0xff] %v266_v7 }
  0x21 PF: > { %p666_p9 = scmp.ge.s32.totalorder %s823_s24, 1  ;;  %p272_p10 = scmp.lt.s32.totalorder %s823_s24, 5 }
  0x23   : > { %p273_p11 = pnand %p666_p9, %p272_p10 }
  0x24   : > { %s279_s27 = sand.u32 (!%p273_p11), 1, %s799_s18   ;;  %p315_p12 = scmp.lt.s32.totalorder (!%p273_p11), %s811_s21, 1 }
  0x25   : > { %276 = sbr.rel (%p273_p11) target bundleno = 368 (0x170), region = 66  ;;  %s667_s28 = sshll.u32 (!%p273_p11), %s279_s27, 6 }
  0x26   : > { %s935_s11 = scalar_lea.vmem (!%p273_p11), [#allocation2], %s667_s28  ;;  %s668_s6 = sshll.u32 (!%p273_p11), %s279_s27, 5 }
  0x27   : > { %s979_s7 = scalar_lea.vmem (!%p273_p11), [#allocation3], %s668_s6  ;;  %p677_p13 = scmp.ne.s32.totalorder (!%p273_p11), %s807_s20, 0 }
  0x2a   : > { %v825_v8 = vmov 0   ;;  %v337_v9 = vld [vmem:[%s1052_s2] sm:$0xff]  ;;  %v339_v10 = vld [vmem:[%s1052_s2 + $0x10] sm:$0xff]  ;;  %s316_s10 = scalar_select %p315_p12, %s811_s21, 1  ;;  %v336_v11 = vld [vmem:[%s935_s11 + $0x38] sm:$0xff]  ;;  %vm361_vm0 = vcmask 523264  }
  0x2b   : > { %767 = vset.pattern.permute.xlu0 %v825_v8  ;;  %768 = vset.pattern.permute.xlu1 %v825_v8  ;;  %v335_v12 = vld [vmem:[%s935_s11 + $0x30] sm:$0xff]  ;;  %v334_v13 = vld [vmem:[%s935_s11 + $0x28] sm:$0xff]  ;;  %v333_v14 = vld [vmem:[%s935_s11 + $0x20] sm:$0xff] }
  0x2c   : > { %343 = vperm.xlu0 %767, %v337_v9   ;;  %353 = vperm.xlu1 %768, %v339_v10   ;;  %s683_s12 = sshll.u32 %s316_s10, 5  ;;  %v338_v15 = vld [vmem:[%s1052_s2 + $0x8] sm:$0xff]  ;;  %v332_v16 = vld [vmem:[%s935_s11 + $0x18] sm:$0xff]  ;;  %v331_v17 = vld [vmem:[%s935_s11 + $0x10] sm:$0xff] }
  0x2d   : > { %382 = vmatpush.msra.mxu0 %v336_v11  ;;  %685 = vmatpush.msra.mxu1 %v336_v11  ;;  %s943_s15 = scalar_lea.vmem %s1054_s4, %s683_s12  ;;  %s948_s28 = scalar_lea.vmem %s1055_s5, %s683_s12  ;;  %v330_v18 = vld [vmem:[%s935_s11 + $0x8] sm:$0xff]  ;;  %v329_v19 = vld [vmem:[%s935_s11] sm:$0xff]  ;;  %v327_v22 = vld [vmem:[%s1051_s1 + $0x10] sm:$0xff] }
  0x2e   : > { %686 = vmatpush.msra.mxu2 %v336_v11  ;;  %687 = vmatpush.msra.mxu3 %v336_v11  ;;  %v325_v20 = vld [vmem:[%s1051_s1] sm:$0xff]  ;;  %v326_v21 = vld [vmem:[%s1051_s1 + $0x8] sm:$0xff]  ;;  %v340_v23 = vld [vmem:[%s1052_s2 + $0x18] sm:$0xff] }
  0x2f   : > { %383 = vmatpush.msra.mxu0 %v335_v12  ;;  %688 = vmatpush.msra.mxu1 %v335_v12  ;;  %v328_v24 = vld [vmem:[%s1051_s1 + $0x18] sm:$0xff] }
  0x30   : > { %689 = vmatpush.msra.mxu2 %v335_v12  ;;  %690 = vmatpush.msra.mxu3 %v335_v12 }
  0x31   : > { %384 = vmatpush.msra.mxu0 %v334_v13  ;;  %691 = vmatpush.msra.mxu1 %v334_v13 }
  0x32   : > { %692 = vmatpush.msra.mxu2 %v334_v13  ;;  %693 = vmatpush.msra.mxu3 %v334_v13 }
  0x33   : > { %385 = vmatpush.msra.mxu0 %v333_v14  ;;  %694 = vmatpush.msra.mxu1 %v333_v14 }
  0x34   : > { %348 = vperm.xlu0 %767, %v338_v15   ;;  %695 = vmatpush.msra.mxu2 %v333_v14 }
  0x35   : > { %386 = vmatpush.msra.mxu0 %v332_v16  ;;  %697 = vmatpush.msra.mxu1 %v332_v16 }
  0x36   : > { %696 = vmatpush.msra.mxu3 %v333_v14  ;;  %698 = vmatpush.msra.mxu2 %v332_v16 }
  0x37   : > { %387 = vmatpush.msra.mxu0 %v331_v17  ;;  %700 = vmatpush.msra.mxu1 %v331_v17 }
  0x38   : > { %699 = vmatpush.msra.mxu3 %v332_v16  ;;  %701 = vmatpush.msra.mxu2 %v331_v17 }
  0x39   : > { %388 = vmatpush.msra.mxu0 %v330_v18  ;;  %703 = vmatpush.msra.mxu1 %v330_v18 }
  0x3a   : > { %702 = vmatpush.msra.mxu3 %v331_v17  ;;  %704 = vmatpush.msra.mxu2 %v330_v18 }
  0x3b   : > { %389 = vmatpush.msra.mxu0 %v329_v19  ;;  %706 = vmatpush.msra.mxu1 %v329_v19 }
  0x3c   : > { %673 = vmatmul.msk.f32.vlgmr.msra.gmra.mxu0 %vm361_vm0, %v325_v20  ;;  %674 = vmatmul.msk.f32.vlgmr.msra.gmra.mxu1 %vm361_vm0, %v326_v21 }
  0x3d   : > { %705 = vmatpush.msra.mxu3 %v330_v18  ;;  %707 = vmatpush.msra.mxu2 %v329_v19 }
  0x3e   : > { %675 = vmatmul.msk.f32.vlgmr.msra.gmra.mxu2 %vm361_vm0, %v327_v22  ;;  %358 = vperm.xlu1 %768, %v340_v23  }
  0x3f   : > { %708 = vmatpush.msra.mxu3 %v329_v19 }
  0x40   : > { %676 = vmatmul.msk.f32.vlgmr.msra.gmra.mxu3 %vm361_vm0, %v328_v24 }
  0x9e   : > { %v344_v25 = vpop.permute.xlu0 %343  ;;  %v354_v27 = vpop.permute.xlu1 %353 }
  0xa6   : > { %v349_v26 = vpop.permute.xlu0 %348 }
  0xb0   : > { %v359_v32 = vpop.permute.xlu1 %358 }
  0xb9   : > { %v391_v28 = vpop.f32.mrf.mxu0  ;;  %v394_v29 = vpop.f32.mrf.mxu1 }
  0xba   : > { %v392_v30 = vadd.f32 %v391_v28, %v344_v25  ;;  %v395_v31 = vadd.f32 %v394_v29, %v349_v26 }
  0xbc   : > { %403 = vst [vmem:[%s979_s7] sm:$0xff] %v392_v30  ;;  %407 = vadd.xlane.f32.xlu2 %v392_v30  ;;  %v415_v37 = vmul.f32 %v392_v30, %v392_v30  ;;  %v416_v38 = vmul.f32 %v395_v31, %v395_v31 }
  0xbd   : > { %404 = vst [vmem:[%s979_s7 + $0x8] sm:$0xff] %v395_v31 }
  0xc1   : > { %v397_v33 = vpop.f32.mrf.mxu2 }
  0xc2   : > { %v398_v34 = vadd.f32 %v397_v33, %v354_v27 }
  0xc3   : > { %v400_v35 = vpop.f32.mrf.mxu3 }
  0xc4   : > { %409 = vadd.xlane.f32.xlu2 %v395_v31  ;;  %405 = vst [vmem:[%s979_s7 + $0x10] sm:$0xff] %v398_v34  ;;  %v401_v36 = vadd.f32 %v400_v35, %v359_v32  ;;  %411 = vadd.xlane.f32.xlu0 %v398_v34  ;;  %v417_v39 = vmul.f32 %v398_v34, %v398_v34 }
  0xc6   : > { %406 = vst [vmem:[%s979_s7 + $0x18] sm:$0xff] %v401_v36  ;;  %413 = vadd.xlane.f32.xlu1 %v401_v36  ;;  %v418_v40 = vmul.f32 %v401_v36, %v401_v36 }
  0xcc   : > { %419 = vadd.xlane.f32.xlu2 %v415_v37 }
  0xd4   : > { %421 = vadd.xlane.f32.xlu2 %v416_v38 }
  0xdc   : > { %423 = vadd.xlane.f32.xlu2 %v417_v39 }
  0xe4   : > { %425 = vadd.xlane.f32.xlu2 %v418_v40 }
 0x12f   : > { %v408_v41 = vpop.xlane.xlu2 %407 }
 0x137   : > { %v410_v42 = vpop.xlane.xlu2 %409  ;;  %v412_v43 = vpop.xlane.xlu0 %411 }
 0x139   : > { %v414_v44 = vpop.xlane.xlu1 %413 }
 0x13f   : > { %v420_v45 = vpop.xlane.xlu2 %419 }
 0x147   : > { %v422_v46 = vpop.xlane.xlu2 %421 }
 0x14f   : > { %v424_v47 = vpop.xlane.xlu2 %423 }
 0x153   : > { %430 = sbr.rel (%p677_p13) target bundleno = 353 (0x161), region = 74 }
 0x157   : > { %v426_v48 = vpop.xlane.xlu2 %425 }
 0x158   : > { %vm431_vm1 = vcmask 7168   ;;  %v826_v49 = vmov 0.0  }
 0x159   : > { %432 = vst.msk [vmem:[%s943_s15] sm:$0xff] %vm431_vm1, %v826_v49 }
 0x15a   : > { %433 = vst.msk [vmem:[%s943_s15 + $0x8] sm:$0xff] %vm431_vm1, %v826_v49 }
 0x15b   : > { %434 = vst.msk [vmem:[%s943_s15 + $0x10] sm:$0xff] %vm431_vm1, %v826_v49 }
 0x15c   : > { %435 = vst.msk [vmem:[%s943_s15 + $0x18] sm:$0xff] %vm431_vm1, %v826_v49 }
 0x15d   : > { %436 = vst.msk [vmem:[%s948_s28] sm:$0xff] %vm431_vm1, %v826_v49 }
 0x15e   : > { %437 = vst.msk [vmem:[%s948_s28 + $0x8] sm:$0xff] %vm431_vm1, %v826_v49 }
 0x15f   : > { %438 = vst.msk [vmem:[%s948_s28 + $0x10] sm:$0xff] %vm431_vm1, %v826_v49 }
 0x160   : > { %439 = vst.msk [vmem:[%s948_s28 + $0x18] sm:$0xff] %vm431_vm1, %v826_v49 }
 0x161 PF: > { %v440_v50 = vld [vmem:[%s943_s15] sm:$0xff]  ;;  %vm448_vm2 = vcmask 7168   ;;  %v441_v51 = vld [vmem:[%s943_s15 + $0x8] sm:$0xff]  ;;  %s679_s18 = sshll.u32 (%p905_p6), %s811_s21, 3  ;;  %v524_v4 = vld [vmem:[%s979_s7 + $0x10] sm:$0xff] (%p905_p6) }
 0x162   : > { %v442_v52 = vld [vmem:[%s943_s15 + $0x10] sm:$0xff]  ;;  %v444_v53 = vadd.f32 %v440_v50, %v408_v41  ;;  %v445_v54 = vadd.f32 %v441_v51, %v410_v42  ;;  %s483_s27 = sadd.s32 (%p905_p6), %s807_s20, %s679_s18  ;;  %v520_v2 = vld [vmem:[%s979_s7] sm:$0xff] (%p905_p6)  ;;  %v522_v3 = vld [vmem:[%s979_s7 + $0x8] sm:$0xff] (%p905_p6) }
 0x163   : > { %v446_v55 = vadd.f32 %v442_v52, %v412_v43  ;;  %v443_v56 = vld [vmem:[%s943_s15 + $0x18] sm:$0xff] }
 0x164   : > { %v453_v57 = vld [vmem:[%s948_s28] sm:$0xff]  ;;  %v447_v59 = vadd.f32 %v443_v56, %v414_v44  ;;  %449 = vst.msk [vmem:[%s943_s15] sm:$0xff] %vm448_vm2, %v444_v53  ;;  %v526_v5 = vld [vmem:[%s979_s7 + $0x18] sm:$0xff] (%p905_p6) }
 0x165   : > { %v454_v58 = vld [vmem:[%s948_s28 + $0x8] sm:$0xff]  ;;  %v457_v61 = vadd.f32 %v453_v57, %v420_v45  ;;  %450 = vst.msk [vmem:[%s943_s15 + $0x8] sm:$0xff] %vm448_vm2, %v445_v54 }
 0x166   : > { %v455_v60 = vld [vmem:[%s948_s28 + $0x10] sm:$0xff]  ;;  %v458_v63 = vadd.f32 %v454_v58, %v422_v46  ;;  %451 = vst.msk [vmem:[%s943_s15 + $0x10] sm:$0xff] %vm448_vm2, %v446_v55 }
 0x167   : > { %v456_v62 = vld [vmem:[%s948_s28 + $0x18] sm:$0xff]  ;;  %v459_v0 = vadd.f32 %v455_v60, %v424_v47  ;;  %452 = vst.msk [vmem:[%s943_s15 + $0x18] sm:$0xff] %vm448_vm2, %v447_v59  ;;  %481 = sbr.rel (!%p905_p6) target bundleno = 368 (0x170), region = 78  ;;  %s680_s15 = sshll.u32 (%p905_p6), %s483_s27, 3 }
 0x168   : > { %v460_v1 = vadd.f32 %v456_v62, %v426_v48  ;;  %461 = vst.msk [vmem:[%s948_s28] sm:$0xff] %vm448_vm2, %v457_v61  ;;  %s485_s12 = scalar_lea.vmem (%p905_p6), %s1053_s3, %s680_s15 }
 0x169   : > { %462 = vst.msk [vmem:[%s948_s28 + $0x8] sm:$0xff] %vm448_vm2, %v458_v63 }
 0x16a   : > { %463 = vst.msk [vmem:[%s948_s28 + $0x10] sm:$0xff] %vm448_vm2, %v459_v0 }
 0x16b   : > { %464 = vst.msk [vmem:[%s948_s28 + $0x18] sm:$0xff] %vm448_vm2, %v460_v1 }
 0x16c   : > { %521 = vst [vmem:[%s485_s12] sm:$0xff] %v520_v2 }
 0x16d   : > { %523 = vst [vmem:[%s485_s12 + $0x10] sm:$0xff] %v522_v3 }
 0x16e   : > { %525 = vst [vmem:[%s485_s12 + $0x20] sm:$0xff] %v524_v4 }
 0x16f   : > { %527 = vst [vmem:[%s485_s12 + $0x30] sm:$0xff] %v526_v5 }
 0x170 PF: > { %s16_s24 = sadd.s32 1, %s823_s24   ;;  %s1057_s18 = smov %s803_s19 }
 0x171   : > { %p13_p0 = scmp.ge.s32.totalorder %s16_s24, 6   ;;  %s1058_s19 = smov %s913_s8 }
 0x172   : > { %s1059_s20 = smov %s815_s22  ;;  %s1060_s21 = smov %s819_s23 }
 0x173   : > { %s1061_s22 = smov %s1064_s25  ;;  %s1062_s23 = smov %s1068_s26 }
 0x174   :  { %15 = sbr.rel (!%p13_p0) target bundleno = 4 (0x4), region = 171 }

</bundles_post_ra>
